<compile_context>
chip_gen: v6e
topology: v6e:2x2x1
jax: 0.10.0
libtpu: 0.0.40
codegen_flags: <defaults>
</compile_context>

<pallas_src>
import math

import jax
import jax.numpy as jnp
from jax.experimental import pallas as pl
from jax.experimental.pallas import tpu as pltpu


def _round_up(x, m):
    return ((x + m - 1) // m) * m


def _fcnet_kernel(x_ref, w1_ref, b1_ref, w2_ref, b2_ref, w3_ref, b3_ref, o_ref):
    # x_ref  : (tm, indim)       token slab (compute dtype)
    # w*_ref : pre-transposed / zero-padded weights (compute dtype), resident
    # b*_ref : (1, dim) f32 rows (broadcast over the token tile)
    # o_ref  : (tm, outp)
    cdt = x_ref.dtype
    x = x_ref[...]

    h1 = jnp.dot(x, w1_ref[...], preferred_element_type=jnp.float32) + b1_ref[...]
    h1 = jnp.maximum(h1, 0.0).astype(cdt)        # back to MXU-native dtype

    h2 = jnp.dot(h1, w2_ref[...], preferred_element_type=jnp.float32) + b2_ref[...]
    h2 = jnp.maximum(h2, 0.0).astype(cdt)

    out = jnp.dot(h2, w3_ref[...], preferred_element_type=jnp.float32) + b3_ref[...]
    o_ref[...] = out.astype(o_ref.dtype)


def prepare_fcnet_params(w1, b1, w2, b2, w3, b3, *, compute_dtype=None):
    """One-time parameter preparation (hoisted out of the forward path).

    nn.Linear stores W as (out_features, in_features); we transpose once so the
    kernel computes plain x @ W, zero-pad hiddim/outdim to multiples of 128 for
    lane-dense vregs/stores (exact for matmul+bias+ReLU), and cast weights to
    the compute dtype.  Biases stay f32 (added to the f32 accumulator).
    """
    hiddim, indim = w1.shape
    outdim = w3.shape[0]
    assert w2.shape == (hiddim, hiddim)
    assert w3.shape == (outdim, hiddim)
    assert b1.shape == (hiddim,) and b2.shape == (hiddim,) and b3.shape == (outdim,)

    if compute_dtype is None:
        compute_dtype = w1.dtype
    compute_dtype = jnp.dtype(compute_dtype)

    hidp = _round_up(hiddim, 128)
    outp = _round_up(outdim, 128)

    def pad2(a, rows, cols):
        return jnp.pad(a, ((0, rows - a.shape[0]), (0, cols - a.shape[1])))

    w1t = pad2(w1.T, indim, hidp).astype(compute_dtype)   # (indim, hidp)
    w2t = pad2(w2.T, hidp, hidp).astype(compute_dtype)    # (hidp,  hidp)
    w3t = pad2(w3.T, hidp, outp).astype(compute_dtype)    # (hidp,  outp)

    b1r = jnp.pad(b1, (0, hidp - hiddim)).reshape(1, hidp).astype(jnp.float32)
    b2r = jnp.pad(b2, (0, hidp - hiddim)).reshape(1, hidp).astype(jnp.float32)
    b3r = jnp.pad(b3, (0, outp - outdim)).reshape(1, outp).astype(jnp.float32)

    return dict(
        w1t=w1t, b1=b1r, w2t=w2t, b2=b2r, w3t=w3t, b3=b3r,
        indim=indim, hiddim=hiddim, outdim=outdim,
        hidp=hidp, outp=outp, compute_dtype=compute_dtype,
    )


def fcnet_forward(x, params, *, tm=512, interpret=False):
    """FCNet forward (eval mode).  x: [..., indim] -> [..., outdim]."""
    p = params
    indim, hidp, outp, outdim = p["indim"], p["hidp"], p["outp"], p["outdim"]
    cdt = p["compute_dtype"]

    orig_shape = x.shape
    assert orig_shape[-1] == indim
    out_dtype = x.dtype
    if x.dtype != cdt:
        x = x.astype(cdt)

    M = 1
    for d in orig_shape[:-1]:
        M *= d
    x2 = x.reshape(M, indim)

    # Large token tile amortizes the ~0.35us/step grid overhead.  No jnp.pad
    # copy of the activations: when M doesn't divide, grid=cdiv and Pallas
    # masks the trailing partial block (garbage rows never written back).
    # When everything fits in one tile, shrink to the exact row count
    # (full-extent blocks are always legal).
    tm = _round_up(max(int(tm), 8), 8)
    if M <= tm:
        tm = M
        grid = (1,)
    else:
        grid = (pl.cdiv(M, tm),)

    cdt_size = jnp.dtype(cdt).itemsize
    out_size = jnp.dtype(out_dtype).itemsize

    # Explicit VMEM budget: single-buffered resident weights + biases,
    # double-buffered x/out tiles, f32 intermediates, generous headroom.
    # Never below the per-chip scoped default, never above 64 MiB (v7x/TC).
    weight_bytes = (indim * hidp + hidp * hidp + hidp * outp) * cdt_size
    bias_bytes = (2 * hidp + outp) * 4
    io_bytes = 2 * tm * (indim * cdt_size + outp * out_size)
    interm_bytes = 2 * tm * hidp * (4 + cdt_size)
    needed = weight_bytes + bias_bytes + io_bytes + interm_bytes
    vmem_limit = int(min(max(2 * needed, 32 << 20) + (4 << 20), 64 << 20))

    flops = 2 * M * (indim * hidp + hidp * hidp + hidp * outp)
    bytes_accessed = (M * indim * cdt_size + M * outp * out_size
                      + weight_bytes + bias_bytes)

    resident = dict(pipeline_mode=pl.Buffered(1))  # grid-invariant: 1 buffer

    out = pl.pallas_call(
        _fcnet_kernel,
        out_shape=jax.ShapeDtypeStruct((M, outp), out_dtype),
        grid_spec=pltpu.PrefetchScalarGridSpec(
            num_scalar_prefetch=0,
            grid=grid,
            in_specs=[
                pl.BlockSpec((tm, indim), lambda i: (i, 0)),                 # x slab
                pl.BlockSpec((indim, hidp), lambda i: (0, 0), **resident),   # W1^T
                pl.BlockSpec((1, hidp), lambda i: (0, 0), **resident),       # b1
                pl.BlockSpec((hidp, hidp), lambda i: (0, 0), **resident),    # W2^T
                pl.BlockSpec((1, hidp), lambda i: (0, 0), **resident),       # b2
                pl.BlockSpec((hidp, outp), lambda i: (0, 0), **resident),    # W3^T
                pl.BlockSpec((1, outp), lambda i: (0, 0), **resident),       # b3
            ],
            out_specs=pl.BlockSpec((tm, outp), lambda i: (i, 0)),
        ),
        compiler_params=pltpu.CompilerParams(
            dimension_semantics=("parallel",),
            vmem_limit_bytes=vmem_limit,
        ),
        cost_estimate=pl.CostEstimate(
            flops=flops, transcendentals=0, bytes_accessed=bytes_accessed),
        interpret=interpret,
    )(x2, p["w1t"], p["b1"], p["w2t"], p["b2"], p["w3t"], p["b3"])

    if outp != outdim:
        out = out[:, :outdim]
    return out.reshape(*orig_shape[:-1], outdim)


def fcnet_reference(x, w1, b1, w2, b2, w3, b3):
    # torch.nn.Linear computes x @ W.T + b (W stored as (out, in)).
    h1 = jax.nn.relu(x @ w1.T + b1)
    h2 = jax.nn.relu(h1 @ w2.T + b2)
    return h2 @ w3.T + b3


if __name__ == "__main__":
    # Small shapes consistent with the module: x [B, N, L, indim]
    B, N, L = 2, 4, 16
    indim, hiddim, outdim = 32, 64, 32

    key = jax.random.PRNGKey(0)
    k_x, k_w1, k_b1, k_w2, k_b2, k_w3, k_b3 = jax.random.split(key, 7)

    x = jax.random.normal(k_x, (B, N, L, indim), dtype=jnp.float32)

    def linear_init(kw, kb, fan_out, fan_in):
        bound = 1.0 / math.sqrt(fan_in)
        w = jax.random.uniform(kw, (fan_out, fan_in), minval=-bound, maxval=bound,
                               dtype=jnp.float32)
        b = jax.random.uniform(kb, (fan_out,), minval=-bound, maxval=bound,
                               dtype=jnp.float32)
        return w, b

    w1, b1 = linear_init(k_w1, k_b1, hiddim, indim)
    w2, b2 = linear_init(k_w2, k_b2, hiddim, hiddim)
    w3, b3 = linear_init(k_w3, k_b3, outdim, hiddim)

    ref = jax.block_until_ready(fcnet_reference(x, w1, b1, w2, b2, w3, b3))

    # f32 compute path: exact match to the reference.
    params_f32 = prepare_fcnet_params(w1, b1, w2, b2, w3, b3,
                                      compute_dtype=jnp.float32)
    out = jax.block_until_ready(fcnet_forward(x, params_f32, tm=512))
    assert out.shape == (B, N, L, outdim)
    err = float(jnp.max(jnp.abs(out - ref)))
    assert jnp.allclose(out, ref, atol=1e-4, rtol=1e-4), err

    # Multi-step grid with a trailing partial (masked) block — no jnp.pad copy.
    x_rag = jax.random.normal(jax.random.PRNGKey(1), (3, 5, 7, indim),
                              dtype=jnp.float32)
    ref_rag = jax.block_until_ready(fcnet_reference(x_rag, w1, b1, w2, b2, w3, b3))
    out_rag = jax.block_until_ready(fcnet_forward(x_rag, params_f32, tm=64))
    assert out_rag.shape == (3, 5, 7, outdim)
    assert jnp.allclose(out_rag, ref_rag, atol=1e-4, rtol=1e-4)

    # bf16 compute path (all three matmuls on the bf16 MXU), loose tolerance.
    params_bf16 = prepare_fcnet_params(w1, b1, w2, b2, w3, b3,
                                       compute_dtype=jnp.bfloat16)
    out_bf16 = jax.block_until_ready(
        fcnet_forward(x.astype(jnp.bfloat16), params_bf16, tm=512))
    assert out_bf16.shape == (B, N, L, outdim)
    assert jnp.allclose(out_bf16.astype(jnp.float32), ref, atol=0.15, rtol=0.05)

    print("KERNEL_OK")
</pallas_src>

<mosaic_0001>
module attributes {stable_mosaic.version = 11 : i64} {
  func.func @_fcnet_kernel(%arg0: i32, %arg1: memref<128x32xf32, #tpu.memory_space<vmem>>, %arg2: memref<32x128xf32, #tpu.memory_space<vmem>>, %arg3: memref<1x128xf32, #tpu.memory_space<vmem>>, %arg4: memref<128x128xf32, #tpu.memory_space<vmem>>, %arg5: memref<1x128xf32, #tpu.memory_space<vmem>>, %arg6: memref<128x128xf32, #tpu.memory_space<vmem>>, %arg7: memref<1x128xf32, #tpu.memory_space<vmem>>, %arg8: memref<128x128xf32, #tpu.memory_space<vmem>>) attributes {dimension_semantics = [#tpu.dimension_semantics<parallel>], iteration_bounds = array<i64: 1>, scalar_prefetch = 0 : i64, scratch_operands = 0 : i64, tpu.core_type = #tpu.core_type<tc>, window_params = [{transform_indices = @transform_0, window_bounds = array<i64: 128, 32>}, {pipeline_mode = #tpu.pipeline_mode<synchronous>, transform_indices = @transform_1, window_bounds = array<i64: 32, 128>}, {pipeline_mode = #tpu.pipeline_mode<synchronous>, transform_indices = @transform_2, window_bounds = array<i64: 1, 128>}, {pipeline_mode = #tpu.pipeline_mode<synchronous>, transform_indices = @transform_3, window_bounds = array<i64: 128, 128>}, {pipeline_mode = #tpu.pipeline_mode<synchronous>, transform_indices = @transform_4, window_bounds = array<i64: 1, 128>}, {pipeline_mode = #tpu.pipeline_mode<synchronous>, transform_indices = @transform_5, window_bounds = array<i64: 128, 128>}, {pipeline_mode = #tpu.pipeline_mode<synchronous>, transform_indices = @transform_6, window_bounds = array<i64: 1, 128>}, {transform_indices = @transform_7, window_bounds = array<i64: 128, 128>}]} {
    %c0 = arith.constant 0 : index
    %c0_0 = arith.constant 0 : index
    %0 = vector.load %arg1[%c0, %c0_0] : memref<128x32xf32, #tpu.memory_space<vmem>>, vector<128x32xf32>
    %c0_1 = arith.constant 0 : index
    %c0_2 = arith.constant 0 : index
    %1 = vector.load %arg2[%c0_1, %c0_2] : memref<32x128xf32, #tpu.memory_space<vmem>>, vector<32x128xf32>
    %cst = arith.constant dense<0.000000e+00> : vector<128x128xf32>
    %2 = tpu.matmul %0, %1, %cst {dimension_numbers = #tpu.dot_dimension_numbers<[1], [0], [0], [1], [0, 0, 1, 1], [], []>} : vector<128x32xf32>, vector<32x128xf32>, vector<128x128xf32> -> vector<128x128xf32>
    %c0_3 = arith.constant 0 : index
    %c0_4 = arith.constant 0 : index
    %3 = vector.load %arg3[%c0_3, %c0_4] : memref<1x128xf32, #tpu.memory_space<vmem>>, vector<1x128xf32>
    %4 = vector.broadcast %3 : vector<1x128xf32> to vector<128x128xf32>
    %5 = arith.addf %2, %4 : vector<128x128xf32>
    %cst_5 = arith.constant 0.000000e+00 : f32
    %6 = vector.broadcast %cst_5 : f32 to vector<128x128xf32>
    %7 = arith.maximumf %5, %6 : vector<128x128xf32>
    %c0_6 = arith.constant 0 : index
    %c0_7 = arith.constant 0 : index
    %8 = vector.load %arg4[%c0_6, %c0_7] : memref<128x128xf32, #tpu.memory_space<vmem>>, vector<128x128xf32>
    %cst_8 = arith.constant dense<0.000000e+00> : vector<128x128xf32>
    %9 = tpu.matmul %7, %8, %cst_8 {dimension_numbers = #tpu.dot_dimension_numbers<[1], [0], [0], [1], [0, 0, 1, 1], [], []>} : vector<128x128xf32>, vector<128x128xf32>, vector<128x128xf32> -> vector<128x128xf32>
    %c0_9 = arith.constant 0 : index
    %c0_10 = arith.constant 0 : index
    %10 = vector.load %arg5[%c0_9, %c0_10] : memref<1x128xf32, #tpu.memory_space<vmem>>, vector<1x128xf32>
    %11 = vector.broadcast %10 : vector<1x128xf32> to vector<128x128xf32>
    %12 = arith.addf %9, %11 : vector<128x128xf32>
    %cst_11 = arith.constant 0.000000e+00 : f32
    %13 = vector.broadcast %cst_11 : f32 to vector<128x128xf32>
    %14 = arith.maximumf %12, %13 : vector<128x128xf32>
    %c0_12 = arith.constant 0 : index
    %c0_13 = arith.constant 0 : index
    %15 = vector.load %arg6[%c0_12, %c0_13] : memref<128x128xf32, #tpu.memory_space<vmem>>, vector<128x128xf32>
    %cst_14 = arith.constant dense<0.000000e+00> : vector<128x128xf32>
    %16 = tpu.matmul %14, %15, %cst_14 {dimension_numbers = #tpu.dot_dimension_numbers<[1], [0], [0], [1], [0, 0, 1, 1], [], []>} : vector<128x128xf32>, vector<128x128xf32>, vector<128x128xf32> -> vector<128x128xf32>
    %c0_15 = arith.constant 0 : index
    %c0_16 = arith.constant 0 : index
    %17 = vector.load %arg7[%c0_15, %c0_16] : memref<1x128xf32, #tpu.memory_space<vmem>>, vector<1x128xf32>
    %18 = vector.broadcast %17 : vector<1x128xf32> to vector<128x128xf32>
    %19 = arith.addf %16, %18 : vector<128x128xf32>
    %c0_17 = arith.constant 0 : index
    %c0_18 = arith.constant 0 : index
    %20 = vector.load %arg8[%c0_17, %c0_18] : memref<128x128xf32, #tpu.memory_space<vmem>>, vector<128x128xf32>
    tpu.vector_store %arg8[%c0_17, %c0_18], %19 {strides = array<i32>} : memref<128x128xf32, #tpu.memory_space<vmem>>, vector<128x128xf32>,
    return
  }
  func.func @transform_0(%arg0: i32) -> (i32, i32) {
    %c0_i32 = arith.constant 0 : i32
    %c0_i32_0 = arith.constant 0 : i32
    return %arg0, %c0_i32 : i32, i32
  }
  func.func @transform_1(%arg0: i32) -> (i32, i32) {
    %c0_i32 = arith.constant 0 : i32
    %c0_i32_0 = arith.constant 0 : i32
    %c0_i32_1 = arith.constant 0 : i32
    return %c0_i32, %c0_i32_0 : i32, i32
  }
  func.func @transform_2(%arg0: i32) -> (i32, i32) {
    %c0_i32 = arith.constant 0 : i32
    %c0_i32_0 = arith.constant 0 : i32
    %c0_i32_1 = arith.constant 0 : i32
    return %c0_i32, %c0_i32_0 : i32, i32
  }
  func.func @transform_3(%arg0: i32) -> (i32, i32) {
    %c0_i32 = arith.constant 0 : i32
    %c0_i32_0 = arith.constant 0 : i32
    %c0_i32_1 = arith.constant 0 : i32
    return %c0_i32, %c0_i32_0 : i32, i32
  }
  func.func @transform_4(%arg0: i32) -> (i32, i32) {
    %c0_i32 = arith.constant 0 : i32
    %c0_i32_0 = arith.constant 0 : i32
    %c0_i32_1 = arith.constant 0 : i32
    return %c0_i32, %c0_i32_0 : i32, i32
  }
  func.func @transform_5(%arg0: i32) -> (i32, i32) {
    %c0_i32 = arith.constant 0 : i32
    %c0_i32_0 = arith.constant 0 : i32
    %c0_i32_1 = arith.constant 0 : i32
    return %c0_i32, %c0_i32_0 : i32, i32
  }
  func.func @transform_6(%arg0: i32) -> (i32, i32) {
    %c0_i32 = arith.constant 0 : i32
    %c0_i32_0 = arith.constant 0 : i32
    %c0_i32_1 = arith.constant 0 : i32
    return %c0_i32, %c0_i32_0 : i32, i32
  }
  func.func @transform_7(%arg0: i32) -> (i32, i32) {
    %c0_i32 = arith.constant 0 : i32
    %c0_i32_0 = arith.constant 0 : i32
    return %arg0, %c0_i32 : i32, i32
  }
}

</mosaic_0001>

<bundles_post_ra>
// kernel: tpu_custom_call.1
= control target key start
LH: loop header
LB: loop body
LE: loop exit
PB: predicated region body
PF: predicated region fallthrough
CT: control target
= control target key end

     0   :  { %12 = vsyncpa [#allocation3], 0  ;;  %s1245_s0 = inlined_call_operand.vmem [shape: f32[128,32], index: 0, kind: input, shape index: {}]   ;;  %s1246_s1 = inlined_call_operand.vmem [shape: f32[32,128], index: 1, kind: input, shape index: {}]   ;;  %s1247_s2 = inlined_call_operand.vmem [shape: f32[1,128], index: 2, kind: input, shape index: {}]   ;;  %s1248_s3 = inlined_call_operand.vmem [shape: f32[128,128], index: 3, kind: input, shape index: {}]   ;;  %s1249_s4 = inlined_call_operand.vmem [shape: f32[1,128], index: 4, kind: input, shape index: {}]   ;;  %s1250_s5 = inlined_call_operand.hbm [shape: f32[128,128], index: 5, kind: input, shape index: {}]   ;;  %s1251_s6 = inlined_call_operand.vmem [shape: f32[1,128], index: 6, kind: input, shape index: {}]   ;;  %s1252_s7 = inlined_call_operand.hbm [shape: f32[128,128], index: 7, kind: output, shape index: {}]  }
   0x1   :  { %13 = vsyncpa [#allocation4], 0  ;;  %s990_s24 = smov [#allocation2]  }
   0x2   :  { %s29_s25 = sshll.u32 %s990_s24, 4  ;;  %s30_s25 = int_to_ptr.vmem [resolvable:$true] %s29_s25 }
   0x3   :  { %s954_s26 = scalar_lea.vmem %s30_s25, 2048  ;;  %p959_p1 = scmp.lt.s32.totalorder %s30_s25, %s30_s25 }
   0x4   :  { %p955_p0 = scmp.ne.s32.totalorder %s30_s25, %s954_s26  ;;  %p960_p2 = scmp.lt.s32.totalorder %s954_s26, %s954_s26 }
   0x6   :  { %p961_p3 = por %p960_p2, %p959_p1 }
   0x8   :  { %p962_p4 = pnand %p961_p3, %p955_p0 }
   0xa   :  { %965 = shalt.err (!%p962_p4)
}
   0xb   :  { %s991_s27 = smov 128   ;;  %s992_s28 = smov 8  }
   0xc   :  { %35 = dma.hbm_to_vmem [thread:$0]  %s1250_s5, 2048, %s30_s25, [#allocation3], %s991_s27, %s991_s27, %s992_s28  }
   0xd   :  { %986 = dma.done.wait [#allocation3], 2048  }
   0xe   :  { %987 = vsyncadd [#allocation3], 4294965248  ;;  %vm68_vm0 = vcmask 261120   ;;  %v60_v0 = vld [vmem:[%s1246_s1 + $0x18] sm:$0xff]  ;;  %v59_v1 = vld [vmem:[%s1246_s1 + $0x10] sm:$0xff] }
   0xf   :  { %766 = vmatprep.subr.mxu0 %v60_v0  ;;  %v41_v2 = vld [vmem:[%s1245_s0] sm:$0xff]  ;;  %v58_v3 = vld [vmem:[%s1246_s1 + $0x8] sm:$0xff]  ;;  %v293_v6 = vld [vmem:[%s1248_s3 + $0x78] sm:$0xff] }
  0x10   :  { %767 = vmatpush3.msra.mxu0 %v60_v0  ;;  %774 = vmatprep.mubr.msk.f32.mxu0 %vm68_vm0, %v41_v2  ;;  %v57_v4 = vld [vmem:[%s1246_s1] sm:$0xff]  ;;  %v42_v5 = vld [vmem:[%s1245_s0 + $0x8] sm:$0xff]  ;;  %v43_v7 = vld [vmem:[%s1245_s0 + $0x10] sm:$0xff] }
  0x11   :  { %768 = vmatprep.subr.mxu0 %v59_v1  ;;  %798 = vmatprep.subr.mxu1 %v293_v6  ;;  %v292_v8 = vld [vmem:[%s1248_s3 + $0x70] sm:$0xff]  ;;  %v291_v9 = vld [vmem:[%s1248_s3 + $0x68] sm:$0xff]  ;;  %v44_v10 = vld [vmem:[%s1245_s0 + $0x18] sm:$0xff] }
  0x12   :  { %769 = vmatpush3.msra.mxu0 %v59_v1  ;;  %799 = vmatpush3.msra.mxu1 %v293_v6  ;;  %v290_v11 = vld [vmem:[%s1248_s3 + $0x60] sm:$0xff]  ;;  %v289_v13 = vld [vmem:[%s1248_s3 + $0x58] sm:$0xff]  ;;  %v46_v14 = vld [vmem:[%s1245_s0 + $0x28] sm:$0xff] }
  0x13   :  { %770 = vmatprep.subr.mxu0 %v58_v3  ;;  %800 = vmatprep.subr.mxu1 %v292_v8  ;;  %v45_v12 = vld [vmem:[%s1245_s0 + $0x20] sm:$0xff]  ;;  %v288_v15 = vld [vmem:[%s1248_s3 + $0x50] sm:$0xff]  ;;  %v287_v17 = vld [vmem:[%s1248_s3 + $0x48] sm:$0xff] }
  0x14   :  { %771 = vmatpush3.msra.mxu0 %v58_v3  ;;  %801 = vmatpush3.msra.mxu1 %v292_v8  ;;  %v47_v16 = vld [vmem:[%s1245_s0 + $0x30] sm:$0xff]  ;;  %v48_v18 = vld [vmem:[%s1245_s0 + $0x38] sm:$0xff]  ;;  %v286_v19 = vld [vmem:[%s1248_s3 + $0x40] sm:$0xff] }
  0x15   :  { %772 = vmatprep.subr.mxu0 %v57_v4  ;;  %802 = vmatprep.subr.mxu1 %v291_v9  ;;  %v49_v20 = vld [vmem:[%s1245_s0 + $0x40] sm:$0xff]  ;;  %v285_v21 = vld [vmem:[%s1248_s3 + $0x38] sm:$0xff]  ;;  %v50_v22 = vld [vmem:[%s1245_s0 + $0x48] sm:$0xff] }
  0x16   :  { %773 = vmatpush3.msra.mxu0 %v57_v4  ;;  %803 = vmatpush3.msra.mxu1 %v291_v9  ;;  %v284_v23 = vld [vmem:[%s1248_s3 + $0x30] sm:$0xff]  ;;  %v283_v25 = vld [vmem:[%s1248_s3 + $0x28] sm:$0xff]  ;;  %v52_v26 = vld [vmem:[%s1245_s0 + $0x58] sm:$0xff] }
  0x17   :  { %775 = vmatmul.mubr.msk.f32.vlgmr.msra.gmra.mxu0 %vm68_vm0, %v42_v5  ;;  %804 = vmatprep.subr.mxu1 %v290_v11  ;;  %v51_v24 = vld [vmem:[%s1245_s0 + $0x50] sm:$0xff]  ;;  %v282_v27 = vld [vmem:[%s1248_s3 + $0x20] sm:$0xff]  ;;  %v54_v29 = vld [vmem:[%s1245_s0 + $0x68] sm:$0xff] }
  0x18   :  { %777 = vmatprep.mubr.msk.f32.mxu0 %vm68_vm0, %v43_v7  ;;  %805 = vmatpush3.msra.mxu1 %v290_v11  ;;  %v53_v28 = vld [vmem:[%s1245_s0 + $0x60] sm:$0xff]  ;;  %v55_v30 = vld [vmem:[%s1245_s0 + $0x70] sm:$0xff]  ;;  %v56_v31 = vld [vmem:[%s1245_s0 + $0x78] sm:$0xff] }
  0x19   :  { %806 = vmatprep.subr.mxu1 %v289_v13  ;;  %v281_v32 = vld [vmem:[%s1248_s3 + $0x18] sm:$0xff]  ;;  %v280_v33 = vld [vmem:[%s1248_s3 + $0x10] sm:$0xff]  ;;  %v279_v34 = vld [vmem:[%s1248_s3 + $0x8] sm:$0xff] }
  0x1a   :  { %807 = vmatpush3.msra.mxu1 %v289_v13  ;;  %v278_v35 = vld [vmem:[%s1248_s3] sm:$0xff]  ;;  %v477_v36 = vld [vmem:[#allocation2 + $0x78] sm:$0xff]  ;;  %v476_v37 = vld [vmem:[#allocation2 + $0x70] sm:$0xff] }
  0x1b   :  { %778 = vmatmul.mubr.msk.f32.gmra.mxu0 %vm68_vm0, %v44_v10  ;;  %808 = vmatprep.subr.mxu1 %v288_v15  ;;  %v475_v38 = vld [vmem:[#allocation2 + $0x68] sm:$0xff]  ;;  %v474_v39 = vld [vmem:[#allocation2 + $0x60] sm:$0xff]  ;;  %v1164_v40 = vld [vmem:[#allocation2 + $0x58] sm:$0xff] }
  0x1c   :  { %780 = vmatprep.mubr.msk.f32.mxu0 %vm68_vm0, %v45_v12  ;;  %809 = vmatpush3.msra.mxu1 %v288_v15  ;;  %v1166_v41 = vld [vmem:[#allocation2 + $0x50] sm:$0xff]  ;;  %v1170_v42 = vld [vmem:[#allocation2 + $0x48] sm:$0xff]  ;;  %v1174_v43 = vld [vmem:[#allocation2 + $0x40] sm:$0xff] }
  0x1d   :  { %810 = vmatprep.subr.mxu1 %v287_v17  ;;  %854 = vmatprep.subr.mxu0 %v477_v36  ;;  %v1178_v44 = vld [vmem:[#allocation2 + $0x38] sm:$0xff]  ;;  %v1182_v45 = vld [vmem:[#allocation2 + $0x30] sm:$0xff]  ;;  %v1186_v46 = vld [vmem:[#allocation2 + $0x28] sm:$0xff] }
  0x1e   :  { %811 = vmatpush3.msra.mxu1 %v287_v17  ;;  %855 = vmatpush3.msra.mxu0 %v477_v36  ;;  %v1190_v47 = vld [vmem:[#allocation2 + $0x20] sm:$0xff] }
  0x1f   :  { %781 = vmatmul.mubr.msk.f32.gmra.mxu0 %vm68_vm0, %v46_v14  ;;  %812 = vmatprep.subr.mxu1 %v286_v19  ;;  %v1199_v48 = vld [vmem:[%s1247_s2] ss:$0 sm:$0xff] }
  0x20   :  { %783 = vmatprep.mubr.msk.f32.mxu0 %vm68_vm0, %v47_v16  ;;  %813 = vmatpush3.msra.mxu1 %v286_v19 }
  0x21   :  { %814 = vmatprep.subr.mxu1 %v285_v21  ;;  %856 = vmatprep.subr.mxu0 %v476_v37 }
  0x22   :  { %815 = vmatpush3.msra.mxu1 %v285_v21  ;;  %857 = vmatpush3.msra.mxu0 %v476_v37 }
  0x23   :  { %784 = vmatmul.mubr.msk.f32.gmra.mxu0 %vm68_vm0, %v48_v18  ;;  %816 = vmatprep.subr.mxu1 %v284_v23 }
  0x24   :  { %786 = vmatprep.mubr.msk.f32.mxu0 %vm68_vm0, %v49_v20  ;;  %817 = vmatpush3.msra.mxu1 %v284_v23 }
  0x25   :  { %818 = vmatprep.subr.mxu1 %v283_v25  ;;  %858 = vmatprep.subr.mxu0 %v475_v38 }
  0x26   :  { %819 = vmatpush3.msra.mxu1 %v283_v25  ;;  %859 = vmatpush3.msra.mxu0 %v475_v38 }
  0x27   :  { %787 = vmatmul.mubr.msk.f32.gmra.mxu0 %vm68_vm0, %v50_v22  ;;  %820 = vmatprep.subr.mxu1 %v282_v27 }
  0x28   :  { %789 = vmatprep.mubr.msk.f32.mxu0 %vm68_vm0, %v51_v24  ;;  %821 = vmatpush3.msra.mxu1 %v282_v27 }
  0x29   :  { %822 = vmatprep.subr.mxu1 %v281_v32  ;;  %860 = vmatprep.subr.mxu0 %v474_v39 }
  0x2a   :  { %823 = vmatpush3.msra.mxu1 %v281_v32  ;;  %861 = vmatpush3.msra.mxu0 %v474_v39 }
  0x2b   :  { %790 = vmatmul.mubr.msk.f32.gmra.mxu0 %vm68_vm0, %v52_v26  ;;  %824 = vmatprep.subr.mxu1 %v280_v33 }
  0x2c   :  { %792 = vmatprep.mubr.msk.f32.mxu0 %vm68_vm0, %v53_v28  ;;  %825 = vmatpush3.msra.mxu1 %v280_v33  ;;  %v465_v33 = vld [vmem:[#allocation2 + $0x18] sm:$0xff] }
  0x2d   :  { %826 = vmatprep.subr.mxu1 %v279_v34  ;;  %862 = vmatprep.subr.mxu0 %v1164_v40 }
  0x2e   :  { %827 = vmatpush3.msra.mxu1 %v279_v34  ;;  %863 = vmatpush3.msra.mxu0 %v1164_v40  ;;  %v464_v34 = vld [vmem:[#allocation2 + $0x10] sm:$0xff] }
  0x2f   :  { %793 = vmatmul.mubr.msk.f32.gmra.mxu0 %vm68_vm0, %v54_v29  ;;  %828 = vmatprep.subr.mxu1 %v278_v35 }
  0x30   :  { %795 = vmatprep.mubr.msk.f32.mxu0 %vm68_vm0, %v55_v30  ;;  %829 = vmatpush3.msra.mxu1 %v278_v35  ;;  %v463_v35 = vld [vmem:[#allocation2 + $0x8] sm:$0xff] }
  0x31   :  { %910 = vmatprep.subr.mxu1 %v477_v36  ;;  %864 = vmatprep.subr.mxu0 %v1166_v41 }
  0x32   :  { %865 = vmatpush3.msra.mxu0 %v1166_v41 }
  0x33   :  { %796 = vmatmul.mubr.msk.f32.gmra.mxu0 %vm68_vm0, %v56_v31  ;;  %866 = vmatprep.subr.mxu0 %v1170_v42 }
  0x34   :  { %867 = vmatpush3.msra.mxu0 %v1170_v42 }
  0x35   :  { %868 = vmatprep.subr.mxu0 %v1174_v43 }
  0x36   :  { %869 = vmatpush3.msra.mxu0 %v1174_v43 }
  0x37   :  { %870 = vmatprep.subr.mxu0 %v1178_v44 }
  0x38   :  { %871 = vmatpush3.msra.mxu0 %v1178_v44 }
  0x39   :  { %872 = vmatprep.subr.mxu0 %v1182_v45 }
  0x3a   :  { %873 = vmatpush3.msra.mxu0 %v1182_v45 }
  0x3b   :  { %874 = vmatprep.subr.mxu0 %v1186_v46 }
  0x3c   :  { %875 = vmatpush3.msra.mxu0 %v1186_v46 }
  0x3d   :  { %876 = vmatprep.subr.mxu0 %v1190_v47 }
  0x3e   :  { %877 = vmatpush3.msra.mxu0 %v1190_v47 }
  0x3f   :  { %878 = vmatprep.subr.mxu0 %v465_v33 }
  0x40   :  { %879 = vmatpush3.msra.mxu0 %v465_v33 }
  0x41   :  { %880 = vmatprep.subr.mxu0 %v464_v34 }
  0x42   :  { %881 = vmatpush3.msra.mxu0 %v464_v34 }
  0x43   :  { %882 = vmatprep.subr.mxu0 %v463_v35 }
  0x44   :  { %883 = vmatpush3.msra.mxu0 %v463_v35 }
  0xd7   :  { %v776_v49 = vpop.f32.mrf.mxu0 }
  0xd8   :  { %v189_v50 = vadd.f32 %v776_v49, %v1199_v48 }
  0xd9   :  { %v183_v51 = vpop.f32.mrf.mxu0 }
  0xda   :  { %v184_v52 = vadd.f32 %v1199_v48, %v183_v51  ;;  %v263_v55 = vmax.f32 %v189_v50, 0.0 }
  0xdb   :  { %v779_v53 = vpop.f32.mrf.mxu0 }
  0xdc   :  { %v262_v54 = vmax.f32 %v184_v52, 0.0  ;;  %v199_v56 = vadd.f32 %v779_v53, %v1199_v48 }
  0xdd   :  { %v193_v57 = vpop.f32.mrf.mxu0 }
  0xde   :  { %v194_v58 = vadd.f32 %v1199_v48, %v193_v57  ;;  %830 = vmatprep.mubr.f32.mxu1 %v262_v54  ;;  %v265_v61 = vmax.f32 %v199_v56, 0.0 }
  0xdf   :  { %v782_v59 = vpop.f32.mrf.mxu0  ;;  %831 = vmatmul.mubr.f32.vlgmr.msra.gmra.mxu1 %v263_v55 }
  0xe0   :  { %v264_v60 = vmax.f32 %v194_v58, 0.0  ;;  %926 = vmatpush3.msra.mxu1 %v477_v36  ;;  %v209_v62 = vadd.f32 %v782_v59, %v1199_v48  ;;  %v462_v36 = vld [vmem:[#allocation2] sm:$0xff] }
  0xe1   :  { %v203_v63 = vpop.f32.mrf.mxu0  ;;  %911 = vmatprep.subr.mxu1 %v476_v37  ;;  %884 = vmatprep.subr.mxu0 %v462_v36 }
  0xe2   :  { %v204_v0 = vadd.f32 %v1199_v48, %v203_v63  ;;  %833 = vmatprep.mubr.f32.mxu1 %v264_v60  ;;  %927 = vmatpush3.msra.mxu1 %v476_v37  ;;  %v267_v3 = vmax.f32 %v209_v62, 0.0  ;;  %v680_v37 = vld [vmem:[%s1249_s4] ss:$0 sm:$0xff] }
  0xe3   :  { %v785_v1 = vpop.f32.mrf.mxu0  ;;  %834 = vmatmul.mubr.f32.gmra.mxu1 %v265_v61  ;;  %912 = vmatprep.subr.mxu1 %v475_v38 }
  0xe4   :  { %v266_v2 = vmax.f32 %v204_v0, 0.0  ;;  %928 = vmatpush3.msra.mxu1 %v475_v38  ;;  %v219_v4 = vadd.f32 %v785_v1, %v1199_v48  ;;  %885 = vmatpush3.msra.mxu0 %v462_v36 }
  0xe5   :  { %v213_v5 = vpop.f32.mrf.mxu0  ;;  %913 = vmatprep.subr.mxu1 %v474_v39 }
  0xe6   :  { %v214_v6 = vadd.f32 %v1199_v48, %v213_v5  ;;  %836 = vmatprep.mubr.f32.mxu1 %v266_v2  ;;  %929 = vmatpush3.msra.mxu1 %v474_v39  ;;  %v269_v9 = vmax.f32 %v219_v4, 0.0 }
  0xe7   :  { %v788_v7 = vpop.f32.mrf.mxu0  ;;  %837 = vmatmul.mubr.f32.gmra.mxu1 %v267_v3  ;;  %914 = vmatprep.subr.mxu1 %v1164_v40 }
  0xe8   :  { %v268_v8 = vmax.f32 %v214_v6, 0.0  ;;  %930 = vmatpush3.msra.mxu1 %v1164_v40  ;;  %v229_v10 = vadd.f32 %v788_v7, %v1199_v48 }
  0xe9   :  { %v223_v11 = vpop.f32.mrf.mxu0  ;;  %915 = vmatprep.subr.mxu1 %v1166_v41 }
  0xea   :  { %v224_v12 = vadd.f32 %v1199_v48, %v223_v11  ;;  %839 = vmatprep.mubr.f32.mxu1 %v268_v8  ;;  %931 = vmatpush3.msra.mxu1 %v1166_v41  ;;  %v271_v15 = vmax.f32 %v229_v10, 0.0 }
  0xeb   :  { %v791_v13 = vpop.f32.mrf.mxu0  ;;  %840 = vmatmul.mubr.f32.gmra.mxu1 %v269_v9  ;;  %916 = vmatprep.subr.mxu1 %v1170_v42 }
  0xec   :  { %v270_v14 = vmax.f32 %v224_v12, 0.0  ;;  %932 = vmatpush3.msra.mxu1 %v1170_v42  ;;  %v239_v16 = vadd.f32 %v791_v13, %v1199_v48 }
  0xed   :  { %v233_v17 = vpop.f32.mrf.mxu0  ;;  %917 = vmatprep.subr.mxu1 %v1174_v43 }
  0xee   :  { %v234_v18 = vadd.f32 %v1199_v48, %v233_v17  ;;  %842 = vmatprep.mubr.f32.mxu1 %v270_v14  ;;  %933 = vmatpush3.msra.mxu1 %v1174_v43  ;;  %v273_v21 = vmax.f32 %v239_v16, 0.0 }
  0xef   :  { %v794_v19 = vpop.f32.mrf.mxu0  ;;  %843 = vmatmul.mubr.f32.gmra.mxu1 %v271_v15  ;;  %918 = vmatprep.subr.mxu1 %v1178_v44 }
  0xf0   :  { %v272_v20 = vmax.f32 %v234_v18, 0.0  ;;  %934 = vmatpush3.msra.mxu1 %v1178_v44  ;;  %v249_v22 = vadd.f32 %v794_v19, %v1199_v48 }
  0xf1   :  { %v243_v23 = vpop.f32.mrf.mxu0  ;;  %919 = vmatprep.subr.mxu1 %v1182_v45 }
  0xf2   :  { %v244_v24 = vadd.f32 %v1199_v48, %v243_v23  ;;  %845 = vmatprep.mubr.f32.mxu1 %v272_v20  ;;  %935 = vmatpush3.msra.mxu1 %v1182_v45  ;;  %v275_v27 = vmax.f32 %v249_v22, 0.0  ;;  %v681_v22 = vld [vmem:[%s1251_s6] ss:$0 sm:$0xff]  ;;  %s993_s6 = smov [#allocation5]  }
  0xf3   :  { %v797_v25 = vpop.f32.mrf.mxu0  ;;  %846 = vmatmul.mubr.f32.gmra.mxu1 %v273_v21  ;;  %920 = vmatprep.subr.mxu1 %v1186_v46  ;;  %s651_s13 = sshll.u32 %s993_s6, 4  ;;  %s652_s13 = int_to_ptr.vmem [resolvable:$true] %s651_s13 }
  0xf4   :  { %v274_v26 = vmax.f32 %v244_v24, 0.0  ;;  %936 = vmatpush3.msra.mxu1 %v1186_v46  ;;  %v259_v28 = vadd.f32 %v797_v25, %v1199_v48  ;;  %s966_s14 = scalar_lea.vmem %s652_s13, 2048  ;;  %p971_p6 = scmp.lt.s32.totalorder %s652_s13, %s652_s13 }
  0xf5   :  { %v253_v29 = vpop.f32.mrf.mxu0  ;;  %921 = vmatprep.subr.mxu1 %v1190_v47  ;;  %p967_p5 = scmp.ne.s32.totalorder %s652_s13, %s966_s14  ;;  %p972_p7 = scmp.lt.s32.totalorder %s966_s14, %s966_s14 }
  0xf6   :  { %v254_v30 = vadd.f32 %v1199_v48, %v253_v29  ;;  %848 = vmatprep.mubr.f32.mxu1 %v274_v26  ;;  %937 = vmatpush3.msra.mxu1 %v1190_v47  ;;  %v277_v32 = vmax.f32 %v259_v28, 0.0 }
  0xf7   :  { %849 = vmatmul.mubr.f32.gmra.mxu1 %v275_v27  ;;  %922 = vmatprep.subr.mxu1 %v465_v33  ;;  %p973_p8 = por %p972_p7, %p971_p6 }
  0xf8   :  { %v276_v31 = vmax.f32 %v254_v30, 0.0  ;;  %938 = vmatpush3.msra.mxu1 %v465_v33 }
  0xf9   :  { %923 = vmatprep.subr.mxu1 %v464_v34  ;;  %p974_p9 = pnand %p973_p8, %p967_p5 }
  0xfa   :  { %851 = vmatprep.mubr.f32.mxu1 %v276_v31  ;;  %939 = vmatpush3.msra.mxu1 %v464_v34 }
  0xfb   :  { %852 = vmatmul.mubr.f32.gmra.mxu1 %v277_v32  ;;  %924 = vmatprep.subr.mxu1 %v463_v35 }
  0xfc   :  { %940 = vmatpush3.msra.mxu1 %v463_v35 }
  0xfd   :  { %925 = vmatprep.subr.mxu1 %v462_v36 }
  0xfe   :  { %941 = vmatpush3.msra.mxu1 %v462_v36 }
 0x19f   :  { %v832_v38 = vpop.f32.mrf.mxu1 }
 0x1a0   :  { %v373_v39 = vadd.f32 %v832_v38, %v680_v37 }
 0x1a1   :  { %v367_v40 = vpop.f32.mrf.mxu1 }
 0x1a2   :  { %v368_v41 = vadd.f32 %v680_v37, %v367_v40  ;;  %v447_v44 = vmax.f32 %v373_v39, 0.0 }
 0x1a3   :  { %v835_v42 = vpop.f32.mrf.mxu1 }
 0x1a4   :  { %v446_v43 = vmax.f32 %v368_v41, 0.0  ;;  %v383_v45 = vadd.f32 %v835_v42, %v680_v37 }
 0x1a5   :  { %v377_v46 = vpop.f32.mrf.mxu1 }
 0x1a6   :  { %v378_v47 = vadd.f32 %v680_v37, %v377_v46  ;;  %886 = vmatprep.mubr.f32.mxu0 %v446_v43  ;;  %v449_v50 = vmax.f32 %v383_v45, 0.0 }
 0x1a7   :  { %v838_v48 = vpop.f32.mrf.mxu1  ;;  %887 = vmatmul.mubr.f32.vlgmr.msra.gmra.mxu0 %v447_v44 }
 0x1a8   :  { %v448_v49 = vmax.f32 %v378_v47, 0.0  ;;  %v393_v51 = vadd.f32 %v838_v48, %v680_v37 }
 0x1a9   :  { %v387_v52 = vpop.f32.mrf.mxu1 }
 0x1aa   :  { %v388_v53 = vadd.f32 %v680_v37, %v387_v52  ;;  %889 = vmatprep.mubr.f32.mxu0 %v448_v49  ;;  %v451_v56 = vmax.f32 %v393_v51, 0.0 }
 0x1ab   :  { %v841_v54 = vpop.f32.mrf.mxu1  ;;  %890 = vmatmul.mubr.f32.gmra.mxu0 %v449_v50 }
 0x1ac   :  { %v450_v55 = vmax.f32 %v388_v53, 0.0  ;;  %v403_v57 = vadd.f32 %v841_v54, %v680_v37 }
 0x1ad   :  { %v397_v58 = vpop.f32.mrf.mxu1 }
 0x1ae   :  { %v398_v59 = vadd.f32 %v680_v37, %v397_v58  ;;  %892 = vmatprep.mubr.f32.mxu0 %v450_v55  ;;  %v453_v62 = vmax.f32 %v403_v57, 0.0 }
 0x1af   :  { %v844_v60 = vpop.f32.mrf.mxu1  ;;  %893 = vmatmul.mubr.f32.gmra.mxu0 %v451_v56 }
 0x1b0   :  { %v452_v61 = vmax.f32 %v398_v59, 0.0  ;;  %v413_v63 = vadd.f32 %v844_v60, %v680_v37 }
 0x1b1   :  { %v407_v0 = vpop.f32.mrf.mxu1 }
 0x1b2   :  { %v408_v1 = vadd.f32 %v680_v37, %v407_v0  ;;  %895 = vmatprep.mubr.f32.mxu0 %v452_v61  ;;  %v455_v4 = vmax.f32 %v413_v63, 0.0 }
 0x1b3   :  { %v847_v2 = vpop.f32.mrf.mxu1  ;;  %896 = vmatmul.mubr.f32.gmra.mxu0 %v453_v62 }
 0x1b4   :  { %v454_v3 = vmax.f32 %v408_v1, 0.0  ;;  %v423_v5 = vadd.f32 %v847_v2, %v680_v37 }
 0x1b5   :  { %v417_v6 = vpop.f32.mrf.mxu1 }
 0x1b6   :  { %v418_v7 = vadd.f32 %v680_v37, %v417_v6  ;;  %898 = vmatprep.mubr.f32.mxu0 %v454_v3  ;;  %v457_v10 = vmax.f32 %v423_v5, 0.0 }
 0x1b7   :  { %v850_v8 = vpop.f32.mrf.mxu1  ;;  %899 = vmatmul.mubr.f32.gmra.mxu0 %v455_v4 }
 0x1b8   :  { %v456_v9 = vmax.f32 %v418_v7, 0.0  ;;  %v433_v11 = vadd.f32 %v850_v8, %v680_v37 }
 0x1b9   :  { %v427_v12 = vpop.f32.mrf.mxu1 }
 0x1ba   :  { %v428_v13 = vadd.f32 %v680_v37, %v427_v12  ;;  %901 = vmatprep.mubr.f32.mxu0 %v456_v9  ;;  %v459_v16 = vmax.f32 %v433_v11, 0.0 }
 0x1bb   :  { %v853_v14 = vpop.f32.mrf.mxu1  ;;  %902 = vmatmul.mubr.f32.gmra.mxu0 %v457_v10 }
 0x1bc   :  { %v458_v15 = vmax.f32 %v428_v13, 0.0  ;;  %v443_v17 = vadd.f32 %v853_v14, %v680_v37 }
 0x1bd   :  { %v437_v18 = vpop.f32.mrf.mxu1 }
 0x1be   :  { %v438_v19 = vadd.f32 %v680_v37, %v437_v18  ;;  %904 = vmatprep.mubr.f32.mxu0 %v458_v15  ;;  %v461_v21 = vmax.f32 %v443_v17, 0.0 }
 0x1bf   :  { %905 = vmatmul.mubr.f32.gmra.mxu0 %v459_v16 }
 0x1c0   :  { %v460_v20 = vmax.f32 %v438_v19, 0.0 }
 0x1c2   :  { %907 = vmatprep.mubr.f32.mxu1 %v460_v20 }
 0x1c3   :  { %908 = vmatmul.mubr.f32.vlgmr.msra.gmra.mxu1 %v461_v21 }
 0x267   :  { %v888_v23 = vpop.f32.mrf.mxu0 }
 0x268   :  { %v557_v24 = vadd.f32 %v888_v23, %v681_v22 }
 0x269   :  { %v551_v25 = vpop.f32.mrf.mxu0 }
 0x26a   :  { %631 = vst [vmem:[#allocation5 + $0x8] sm:$0xff] %v557_v24  ;;  %v552_v26 = vadd.f32 %v681_v22, %v551_v25 }
 0x26b   :  { %v891_v27 = vpop.f32.mrf.mxu0 }
 0x26c   :  { %630 = vst [vmem:[#allocation5] sm:$0xff] %v552_v26  ;;  %v567_v28 = vadd.f32 %v891_v27, %v681_v22 }
 0x26d   :  { %v561_v29 = vpop.f32.mrf.mxu0 }
 0x26e   :  { %633 = vst [vmem:[#allocation5 + $0x18] sm:$0xff] %v567_v28  ;;  %v562_v30 = vadd.f32 %v681_v22, %v561_v29 }
 0x26f   :  { %v894_v31 = vpop.f32.mrf.mxu0 }
 0x270   :  { %632 = vst [vmem:[#allocation5 + $0x10] sm:$0xff] %v562_v30  ;;  %v577_v32 = vadd.f32 %v894_v31, %v681_v22 }
 0x271   :  { %v571_v33 = vpop.f32.mrf.mxu0 }
 0x272   :  { %635 = vst [vmem:[#allocation5 + $0x28] sm:$0xff] %v577_v32  ;;  %v572_v34 = vadd.f32 %v681_v22, %v571_v33 }
 0x273   :  { %v897_v35 = vpop.f32.mrf.mxu0 }
 0x274   :  { %634 = vst [vmem:[#allocation5 + $0x20] sm:$0xff] %v572_v34  ;;  %v587_v36 = vadd.f32 %v897_v35, %v681_v22 }
 0x275   :  { %v581_v37 = vpop.f32.mrf.mxu0 }
 0x276   :  { %637 = vst [vmem:[#allocation5 + $0x38] sm:$0xff] %v587_v36  ;;  %v582_v38 = vadd.f32 %v681_v22, %v581_v37 }
 0x277   :  { %v900_v39 = vpop.f32.mrf.mxu0 }
 0x278   :  { %636 = vst [vmem:[#allocation5 + $0x30] sm:$0xff] %v582_v38  ;;  %v597_v40 = vadd.f32 %v900_v39, %v681_v22 }
 0x279   :  { %v591_v41 = vpop.f32.mrf.mxu0 }
 0x27a   :  { %639 = vst [vmem:[#allocation5 + $0x48] sm:$0xff] %v597_v40  ;;  %v592_v42 = vadd.f32 %v681_v22, %v591_v41 }
 0x27b   :  { %v903_v43 = vpop.f32.mrf.mxu0 }
 0x27c   :  { %638 = vst [vmem:[#allocation5 + $0x40] sm:$0xff] %v592_v42  ;;  %v607_v44 = vadd.f32 %v903_v43, %v681_v22 }
 0x27d   :  { %v601_v45 = vpop.f32.mrf.mxu0 }
 0x27e   :  { %641 = vst [vmem:[#allocation5 + $0x58] sm:$0xff] %v607_v44  ;;  %v602_v46 = vadd.f32 %v681_v22, %v601_v45 }
 0x27f   :  { %v906_v47 = vpop.f32.mrf.mxu0 }
 0x280   :  { %640 = vst [vmem:[#allocation5 + $0x50] sm:$0xff] %v602_v46  ;;  %v617_v48 = vadd.f32 %v906_v47, %v681_v22 }
 0x281   :  { %v611_v49 = vpop.f32.mrf.mxu0 }
 0x282   :  { %643 = vst [vmem:[#allocation5 + $0x68] sm:$0xff] %v617_v48  ;;  %v612_v50 = vadd.f32 %v681_v22, %v611_v49 }
 0x283   :  { %v909_v51 = vpop.f32.mrf.mxu1 }
 0x284   :  { %642 = vst [vmem:[#allocation5 + $0x60] sm:$0xff] %v612_v50  ;;  %v627_v52 = vadd.f32 %v909_v51, %v681_v22 }
 0x285   :  { %v621_v53 = vpop.f32.mrf.mxu1 }
 0x286   :  { %645 = vst [vmem:[#allocation5 + $0x78] sm:$0xff] %v627_v52  ;;  %v622_v54 = vadd.f32 %v681_v22, %v621_v53 }
 0x288   :  { %644 = vst [vmem:[#allocation5 + $0x70] sm:$0xff] %v622_v54 }
 0x289   :  { %977 = shalt.err (!%p974_p9)
}
 0x28a   :  { %657 = dma.vmem_to_hbm [thread:$0]  %s652_s13, 2048, %s1252_s7, [#allocation4], %s991_s27, %s991_s27, %s992_s28  }
 0x28b   :  { %988 = dma.done.wait [#allocation4], 2048  }
 0x28c   :  { %989 = vsyncadd [#allocation4], 4294965248 }
 0x28d   :  { %661 = vsyncpa [#allocation3], 1 }
 0x28e   :  { %662 = vsyncpa [#allocation4], 1 }

</bundles_post_ra>
